<compile_context>
chip_gen: v7x
topology: tpu7x:2x2x1
jax: 0.10.0
libtpu: 0.0.40
codegen_flags: <defaults>
</compile_context>

<pallas_src>
import jax
import jax.numpy as jnp
from jax.experimental import pallas as pl
from jax.experimental.pallas import tpu as pltpu

IN_DIM = 312
H1 = 128
H2 = 128
H3 = 64
OUT = 1

# Batch tile (rows per grid step). bf16 x tile at 4096 rows is ~2.5 MB
# (x2 pipeline buffers), safe under v5e/v6e/v7x scoped-VMEM defaults.
DEFAULT_TB = 4096


def _round_up(a, b):
    return (a + b - 1) // b * b


def _choose_tb(n, tb):
    """Pick the batch tile.

    - tiny batches (n <= 16): one block covering the whole batch (block dims ==
      full array dims, so no divisibility constraints).
    - otherwise: at least two grid steps (keeps both v7x TensorCores busy and
      lets input/output DMA pipeline against compute), tile rounded up to a
      multiple of 16 rows (bf16 sublane packing), capped at `tb`.
    """
    if n <= 16:
        return n
    target = min(tb, pl.cdiv(n, 2))
    return max(16, _round_up(target, 16))


def discriminator_kernel(x_ref,
                         w1_ref, b1_ref,
                         w2_ref, b2_ref,
                         w3_ref, b3_ref,
                         w4_ref, b4_ref,
                         o_ref):
    x = x_ref[...]  # bf16 [TB, 312]

    # Linear(312, 128) -> ReLU   (bf16 operands, f32 accumulate)
    h = jnp.dot(x, w1_ref[...], preferred_element_type=jnp.float32) + b1_ref[...]
    h = jnp.maximum(h, 0.0).astype(jnp.bfloat16)

    # Linear(128, 128) -> ReLU
    h = jnp.dot(h, w2_ref[...], preferred_element_type=jnp.float32) + b2_ref[...]
    h = jnp.maximum(h, 0.0).astype(jnp.bfloat16)

    # Linear(128, 64) -> ReLU   (keep f32 for the head)
    h = jnp.dot(h, w3_ref[...], preferred_element_type=jnp.float32) + b3_ref[...]
    h = jnp.maximum(h, 0.0)

    # Linear(64, 1): VPU broadcast-multiply + lane reduction (N=1 MXU matmul
    # would be ~1% utilized and still pay result-FIFO latency).
    o_ref[...] = jnp.sum(h * w4_ref[...], axis=-1, keepdims=True) + b4_ref[...]


def init_params(key):
    """Deterministic init mimicking PyTorch nn.Linear defaults:
    weight, bias ~ U(-1/sqrt(fan_in), 1/sqrt(fan_in)). Master copies in f32."""
    ks = jax.random.split(key, 8)

    def linear(kw, kb, fan_in, fan_out):
        bound = 1.0 / jnp.sqrt(jnp.float32(fan_in))
        w = jax.random.uniform(kw, (fan_in, fan_out), jnp.float32, -bound, bound)
        b = jax.random.uniform(kb, (1, fan_out), jnp.float32, -bound, bound)
        return w, b

    w1, b1 = linear(ks[0], ks[1], IN_DIM, H1)
    w2, b2 = linear(ks[2], ks[3], H1, H2)
    w3, b3 = linear(ks[4], ks[5], H2, H3)
    w4, b4 = linear(ks[6], ks[7], H3, OUT)

    return dict(
        w1=w1, b1=b1,
        w2=w2, b2=b2,
        w3=w3, b3=b3,
        # final layer stored as a row vector so the kernel can do a VPU
        # multiply + lane reduce instead of an N=1 MXU matmul.
        w4=w4.T.reshape(1, H3), b4=b4.reshape(1, OUT),
    )


def discriminator_forward(x, params, *, tb=DEFAULT_TB):
    n = x.shape[0]
    assert x.shape[1] == IN_DIM, x.shape

    TB = _choose_tb(n, tb)
    grid = (pl.cdiv(n, TB),)

    # bf16 feed for the HBM-dominant x read and the MXU operands; biases and
    # the tiny VPU head stay f32.
    x_b = x.astype(jnp.bfloat16)
    w1 = params["w1"].astype(jnp.bfloat16)
    w2 = params["w2"].astype(jnp.bfloat16)
    w3 = params["w3"].astype(jnp.bfloat16)

    batch_spec = pl.BlockSpec((TB, IN_DIM), lambda i: (i, 0))
    out_spec = pl.BlockSpec((TB, OUT), lambda i: (i, 0))

    def resident(shape):
        # Full-block, constant index_map -> stays VMEM-resident across the grid.
        return pl.BlockSpec(shape, lambda i: (0, 0))

    in_specs = [
        batch_spec,
        resident((IN_DIM, H1)), resident((1, H1)),
        resident((H1, H2)), resident((1, H2)),
        resident((H2, H3)), resident((1, H3)),
        resident((1, H3)), resident((1, OUT)),
    ]

    flops = 2 * n * (IN_DIM * H1 + H1 * H2 + H2 * H3 + H3 * OUT)
    param_bytes = (2 * (IN_DIM * H1 + H1 * H2 + H2 * H3)       # bf16 weights
                   + 4 * (H1 + H2 + H3 + H3 + OUT))            # f32 biases + head
    bytes_accessed = 2 * n * IN_DIM + 4 * n * OUT + param_bytes

    out = pl.pallas_call(
        discriminator_kernel,
        out_shape=jax.ShapeDtypeStruct((n, OUT), jnp.float32),
        grid=grid,
        in_specs=in_specs,
        out_specs=out_spec,
        compiler_params=pltpu.CompilerParams(
            dimension_semantics=("parallel",),
        ),
        cost_estimate=pl.CostEstimate(
            flops=flops, transcendentals=0, bytes_accessed=bytes_accessed),
    )(x_b,
      w1, params["b1"],
      w2, params["b2"],
      w3, params["b3"],
      params["w4"], params["b4"])

    return out


def _reference_forward(x, params):
    """Pure-JAX reference that mirrors the kernel's bf16 quantization points
    (bf16 x bf16 products are exact in f32, so this matches tightly)."""
    bf = lambda a: a.astype(jnp.bfloat16).astype(jnp.float32)
    h = jnp.maximum(bf(x) @ bf(params["w1"]) + params["b1"], 0.0)
    h = jnp.maximum(bf(h) @ bf(params["w2"]) + params["b2"], 0.0)
    h = jnp.maximum(bf(h) @ bf(params["w3"]) + params["b3"], 0.0)
    return jnp.sum(h * params["w4"], axis=-1, keepdims=True) + params["b4"]


if __name__ == "__main__":
    key = jax.random.PRNGKey(0)
    kparam, kx = jax.random.split(key)
    params = init_params(kparam)

    n = 8
    x = jax.random.normal(kx, (n, IN_DIM), jnp.float32)

    out = jax.block_until_ready(discriminator_forward(x, params))
    assert out.shape == (n, OUT), out.shape
    assert out.dtype == jnp.float32

    ref = jax.block_until_ready(_reference_forward(x, params))
    assert jnp.allclose(out, ref, atol=1e-3, rtol=1e-3), float(
        jnp.max(jnp.abs(out - ref)))

    print("KERNEL_OK")
</pallas_src>

<mosaic_0001>
module attributes {stable_mosaic.version = 11 : i64} {
  func.func @discriminator_kernel(%arg0: i32, %arg1: memref<8x312xbf16, #tpu.memory_space<vmem>>, %arg2: memref<312x128xbf16, #tpu.memory_space<vmem>>, %arg3: memref<1x128xf32, #tpu.memory_space<vmem>>, %arg4: memref<128x128xbf16, #tpu.memory_space<vmem>>, %arg5: memref<1x128xf32, #tpu.memory_space<vmem>>, %arg6: memref<128x64xbf16, #tpu.memory_space<vmem>>, %arg7: memref<1x64xf32, #tpu.memory_space<vmem>>, %arg8: memref<1x64xf32, #tpu.memory_space<vmem>>, %arg9: memref<1x1xf32, #tpu.memory_space<vmem>>, %arg10: memref<8x1xf32, #tpu.memory_space<vmem>>) attributes {dimension_semantics = [#tpu.dimension_semantics<parallel>], iteration_bounds = array<i64: 1>, scalar_prefetch = 0 : i64, scratch_operands = 0 : i64, tpu.core_type = #tpu.core_type<tc>, window_params = [{transform_indices = @transform_0, window_bounds = array<i64: 8, 312>}, {pipeline_mode = #tpu.pipeline_mode<synchronous>, transform_indices = @transform_1, window_bounds = array<i64: 312, 128>}, {pipeline_mode = #tpu.pipeline_mode<synchronous>, transform_indices = @transform_2, window_bounds = array<i64: 1, 128>}, {pipeline_mode = #tpu.pipeline_mode<synchronous>, transform_indices = @transform_3, window_bounds = array<i64: 128, 128>}, {pipeline_mode = #tpu.pipeline_mode<synchronous>, transform_indices = @transform_4, window_bounds = array<i64: 1, 128>}, {pipeline_mode = #tpu.pipeline_mode<synchronous>, transform_indices = @transform_5, window_bounds = array<i64: 128, 64>}, {pipeline_mode = #tpu.pipeline_mode<synchronous>, transform_indices = @transform_6, window_bounds = array<i64: 1, 64>}, {pipeline_mode = #tpu.pipeline_mode<synchronous>, transform_indices = @transform_7, window_bounds = array<i64: 1, 64>}, {pipeline_mode = #tpu.pipeline_mode<synchronous>, transform_indices = @transform_8, window_bounds = array<i64: 1, 1>}, {transform_indices = @transform_9, window_bounds = array<i64: 8, 1>}]} {
    %c0 = arith.constant 0 : index
    %c0_0 = arith.constant 0 : index
    %0 = vector.load %arg1[%c0, %c0_0] : memref<8x312xbf16, #tpu.memory_space<vmem>>, vector<8x312xbf16>
    %c0_1 = arith.constant 0 : index
    %c0_2 = arith.constant 0 : index
    %1 = vector.load %arg2[%c0_1, %c0_2] : memref<312x128xbf16, #tpu.memory_space<vmem>>, vector<312x128xbf16>
    %cst = arith.constant dense<0.000000e+00> : vector<8x128xf32>
    %2 = tpu.matmul %0, %1, %cst {dimension_numbers = #tpu.dot_dimension_numbers<[1], [0], [0], [1], [0, 0, 1, 1], [], []>} : vector<8x312xbf16>, vector<312x128xbf16>, vector<8x128xf32> -> vector<8x128xf32>
    %c0_3 = arith.constant 0 : index
    %c0_4 = arith.constant 0 : index
    %3 = vector.load %arg3[%c0_3, %c0_4] : memref<1x128xf32, #tpu.memory_space<vmem>>, vector<1x128xf32>
    %4 = vector.broadcast %3 : vector<1x128xf32> to vector<8x128xf32>
    %5 = arith.addf %2, %4 : vector<8x128xf32>
    %cst_5 = arith.constant 0.000000e+00 : f32
    %6 = vector.broadcast %cst_5 : f32 to vector<8x128xf32>
    %7 = arith.maximumf %5, %6 : vector<8x128xf32>
    %8 = arith.truncf %7 : vector<8x128xf32> to vector<8x128xbf16>
    %c0_6 = arith.constant 0 : index
    %c0_7 = arith.constant 0 : index
    %9 = vector.load %arg4[%c0_6, %c0_7] : memref<128x128xbf16, #tpu.memory_space<vmem>>, vector<128x128xbf16>
    %cst_8 = arith.constant dense<0.000000e+00> : vector<8x128xf32>
    %10 = tpu.matmul %8, %9, %cst_8 {dimension_numbers = #tpu.dot_dimension_numbers<[1], [0], [0], [1], [0, 0, 1, 1], [], []>} : vector<8x128xbf16>, vector<128x128xbf16>, vector<8x128xf32> -> vector<8x128xf32>
    %c0_9 = arith.constant 0 : index
    %c0_10 = arith.constant 0 : index
    %11 = vector.load %arg5[%c0_9, %c0_10] : memref<1x128xf32, #tpu.memory_space<vmem>>, vector<1x128xf32>
    %12 = vector.broadcast %11 : vector<1x128xf32> to vector<8x128xf32>
    %13 = arith.addf %10, %12 : vector<8x128xf32>
    %cst_11 = arith.constant 0.000000e+00 : f32
    %14 = vector.broadcast %cst_11 : f32 to vector<8x128xf32>
    %15 = arith.maximumf %13, %14 : vector<8x128xf32>
    %16 = arith.truncf %15 : vector<8x128xf32> to vector<8x128xbf16>
    %c0_12 = arith.constant 0 : index
    %c0_13 = arith.constant 0 : index
    %17 = vector.load %arg6[%c0_12, %c0_13] : memref<128x64xbf16, #tpu.memory_space<vmem>>, vector<128x64xbf16>
    %cst_14 = arith.constant dense<0.000000e+00> : vector<8x64xf32>
    %18 = tpu.matmul %16, %17, %cst_14 {dimension_numbers = #tpu.dot_dimension_numbers<[1], [0], [0], [1], [0, 0, 1, 1], [], []>} : vector<8x128xbf16>, vector<128x64xbf16>, vector<8x64xf32> -> vector<8x64xf32>
    %c0_15 = arith.constant 0 : index
    %c0_16 = arith.constant 0 : index
    %19 = vector.load %arg7[%c0_15, %c0_16] : memref<1x64xf32, #tpu.memory_space<vmem>>, vector<1x64xf32>
    %20 = vector.broadcast %19 : vector<1x64xf32> to vector<8x64xf32>
    %21 = arith.addf %18, %20 : vector<8x64xf32>
    %cst_17 = arith.constant 0.000000e+00 : f32
    %22 = vector.broadcast %cst_17 : f32 to vector<8x64xf32>
    %23 = arith.maximumf %21, %22 : vector<8x64xf32>
    %c0_18 = arith.constant 0 : index
    %c0_19 = arith.constant 0 : index
    %24 = vector.load %arg8[%c0_18, %c0_19] : memref<1x64xf32, #tpu.memory_space<vmem>>, vector<1x64xf32>
    %25 = vector.broadcast %24 : vector<1x64xf32> to vector<8x64xf32>
    %26 = arith.mulf %23, %25 : vector<8x64xf32>
    %cst_20 = arith.constant dense<0.000000e+00> : vector<8xf32>
    %27 = vector.multi_reduction <add>, %26, %cst_20 [1] : vector<8x64xf32> to vector<8xf32>
    %28 = vector.shape_cast %27 : vector<8xf32> to vector<8x1xf32>
    %c0_21 = arith.constant 0 : index
    %c0_22 = arith.constant 0 : index
    %29 = vector.load %arg9[%c0_21, %c0_22] : memref<1x1xf32, #tpu.memory_space<vmem>>, vector<1x1xf32>
    %30 = vector.broadcast %29 : vector<1x1xf32> to vector<8x1xf32>
    %31 = arith.addf %28, %30 : vector<8x1xf32>
    %c0_23 = arith.constant 0 : index
    %c0_24 = arith.constant 0 : index
    %32 = vector.load %arg10[%c0_23, %c0_24] : memref<8x1xf32, #tpu.memory_space<vmem>>, vector<8x1xf32>
    tpu.vector_store %arg10[%c0_23, %c0_24], %31 {strides = array<i32>} : memref<8x1xf32, #tpu.memory_space<vmem>>, vector<8x1xf32>,
    return
  }
  func.func @transform_0(%arg0: i32) -> (i32, i32) {
    %c0_i32 = arith.constant 0 : i32
    %c0_i32_0 = arith.constant 0 : i32
    return %arg0, %c0_i32 : i32, i32
  }
  func.func @transform_1(%arg0: i32) -> (i32, i32) {
    %c0_i32 = arith.constant 0 : i32
    %c0_i32_0 = arith.constant 0 : i32
    %c0_i32_1 = arith.constant 0 : i32
    return %c0_i32, %c0_i32_0 : i32, i32
  }
  func.func @transform_2(%arg0: i32) -> (i32, i32) {
    %c0_i32 = arith.constant 0 : i32
    %c0_i32_0 = arith.constant 0 : i32
    %c0_i32_1 = arith.constant 0 : i32
    return %c0_i32, %c0_i32_0 : i32, i32
  }
  func.func @transform_3(%arg0: i32) -> (i32, i32) {
    %c0_i32 = arith.constant 0 : i32
    %c0_i32_0 = arith.constant 0 : i32
    %c0_i32_1 = arith.constant 0 : i32
    return %c0_i32, %c0_i32_0 : i32, i32
  }
  func.func @transform_4(%arg0: i32) -> (i32, i32) {
    %c0_i32 = arith.constant 0 : i32
    %c0_i32_0 = arith.constant 0 : i32
    %c0_i32_1 = arith.constant 0 : i32
    return %c0_i32, %c0_i32_0 : i32, i32
  }
  func.func @transform_5(%arg0: i32) -> (i32, i32) {
    %c0_i32 = arith.constant 0 : i32
    %c0_i32_0 = arith.constant 0 : i32
    %c0_i32_1 = arith.constant 0 : i32
    return %c0_i32, %c0_i32_0 : i32, i32
  }
  func.func @transform_6(%arg0: i32) -> (i32, i32) {
    %c0_i32 = arith.constant 0 : i32
    %c0_i32_0 = arith.constant 0 : i32
    %c0_i32_1 = arith.constant 0 : i32
    return %c0_i32, %c0_i32_0 : i32, i32
  }
  func.func @transform_7(%arg0: i32) -> (i32, i32) {
    %c0_i32 = arith.constant 0 : i32
    %c0_i32_0 = arith.constant 0 : i32
    %c0_i32_1 = arith.constant 0 : i32
    return %c0_i32, %c0_i32_0 : i32, i32
  }
  func.func @transform_8(%arg0: i32) -> (i32, i32) {
    %c0_i32 = arith.constant 0 : i32
    %c0_i32_0 = arith.constant 0 : i32
    %c0_i32_1 = arith.constant 0 : i32
    return %c0_i32, %c0_i32_0 : i32, i32
  }
  func.func @transform_9(%arg0: i32) -> (i32, i32) {
    %c0_i32 = arith.constant 0 : i32
    %c0_i32_0 = arith.constant 0 : i32
    return %arg0, %c0_i32 : i32, i32
  }
}

</mosaic_0001>

<bundles_post_ra>
// kernel: tpu_custom_call.1
= control target key start
LH: loop header
LB: loop body
LE: loop exit
PB: predicated region body
PF: predicated region fallthrough
CT: control target
= control target key end

     0   :  { %s941_s0 = inlined_call_operand.vmem [shape: bf16[8,312], index: 0, kind: input, shape index: {}]   ;;  %s942_s1 = inlined_call_operand.hbm [shape: bf16[312,128], index: 1, kind: input, shape index: {}]   ;;  %s943_s2 = inlined_call_operand.vmem [shape: f32[1,128], index: 2, kind: input, shape index: {}]   ;;  %s944_s3 = inlined_call_operand.vmem [shape: bf16[128,128], index: 3, kind: input, shape index: {}]   ;;  %s945_s4 = inlined_call_operand.vmem [shape: f32[1,128], index: 4, kind: input, shape index: {}]   ;;  %s946_s5 = inlined_call_operand.vmem [shape: bf16[128,64], index: 5, kind: input, shape index: {}]   ;;  %s947_s6 = inlined_call_operand.vmem [shape: f32[1,64], index: 6, kind: input, shape index: {}]   ;;  %s948_s7 = inlined_call_operand.vmem [shape: f32[1,64], index: 7, kind: input, shape index: {}]   ;;  %s949_s8 = inlined_call_operand.<no memory space> [shape: f32[1,1], index: 8, kind: input, shape index: {}]   ;;  %s950_s9 = inlined_call_operand.vmem [shape: f32[8,1], index: 9, kind: output, shape index: {}]  }
   0x1   :  { %v14_v0 = vstv %s949_s8 }
   0x2   :  { %15 = vst [vmem:[#allocation2] sm:$0x1] %v14_v0 }
   0x3   :  { %16 = vsyncpa [#allocation4], 0  ;;  %s776_s11 = smov [#allocation3]   ;;  %s752_s15 = scalar_lea.hbm %s942_s1, 2496 }
   0x4   :  { %s24_s12 = sshll.u32 %s776_s11, 4  ;;  %p753_p0 = scmp.ne.s32.totalorder %s942_s1, %s752_s15  ;;  %s25_s12 = int_to_ptr.vmem [resolvable:$true] %s24_s12 }
   0x5   :  { %p756_p1 = scmp.lt.u32.totalorder %s752_s15, %s942_s1 }
   0x7   :  { %p758_p2 = pnand %p756_p1, %p753_p0 }
   0x9   :  { %761 = shalt.err (!%p758_p2)
}
   0xa   :  { %s762_s8 = scalar_lea.vmem %s25_s12, 2496  ;;  %p767_p4 = scmp.lt.s32.totalorder %s25_s12, %s25_s12 }
   0xb   :  { %p763_p3 = scmp.ne.s32.totalorder %s25_s12, %s762_s8  ;;  %p768_p5 = scmp.lt.s32.totalorder %s762_s8, %s762_s8 }
   0xd   :  { %p769_p6 = por %p768_p5, %p767_p4 }
   0xf   :  { %p770_p7 = pnand %p769_p6, %p763_p3 }
  0x11   :  { %773 = shalt.err (!%p770_p7)
}
  0x12   :  { %s777_s20 = smov 64   ;;  %s778_s21 = smov 4  }
  0x13   :  { %30 = dma.hbm_to_vmem [thread:$0]  %s942_s1, 2496, %s25_s12, [#allocation4], %s777_s20, %s777_s20, %s778_s21  }
  0x14   :  { %774 = dma.done.wait [#allocation4], 2496  }
  0x15   :  { %775 = vsyncadd [#allocation4], 4294964800  ;;  %v779_v1 = vmov 0.0   ;;  %vm780_vm0 = vmmov 0   ;;  %v713_v2 = vld [vmem:[#allocation3 + $0x40] sm:$0xff]   ;;  %v715_v4 = vld [vmem:[#allocation3 + $0x48] sm:$0xff]  }
  0x16   :  { %656 = vmatprep.subr.bf16.mxu1 %v779_v1  ;;  %664 = vmatprep.mubr.msk.bf16.mxu1 %vm780_vm0, %v779_v1  ;;  %v714_v3 = vld [vmem:[#allocation3] sm:$0xff]   ;;  %v716_v5 = vld [vmem:[#allocation3 + $0x8] sm:$0xff]   ;;  %v717_v6 = vld [vmem:[#allocation3 + $0x50] sm:$0xff]   ;;  %vm228_vm1 = vcmask 1043456   ;;  %vm224_vm2 = vcmask 457728   ;;  %vm547_vm3 = vcmask 523264  }
  0x17   :  { %611 = vmatprep.subr.bf16.mxu0 %v713_v2  ;;  %v718_v7 = vld [vmem:[#allocation3 + $0x10] sm:$0xff]   ;;  %v719_v8 = vld [vmem:[#allocation3 + $0x58] sm:$0xff]   ;;  %v723_v9 = vld [vmem:[#allocation3 + $0x80] sm:$0xff]   ;;  %vm559_vm4 = vcmask 7168  }
  0x18   :  { %612 = vmatpush3.bf16.msra.mxu0 %v714_v3  ;;  %v720_v10 = vld [vmem:[#allocation3 + $0x18] sm:$0xff]   ;;  %v721_v11 = vld [vmem:[#allocation3 + $0x60] sm:$0xff]   ;;  %657 = vmatpush3.bf16.msra.mxu1 %v723_v9  ;;  %v726_v12 = vld [vmem:[#allocation3 + $0x88] sm:$0xff]  }
  0x19   :  { %613 = vmatprep.subr.bf16.mxu0 %v715_v4  ;;  %658 = vmatprep.subr.bf16.mxu1 %v779_v1  ;;  %v722_v13 = vld [vmem:[#allocation3 + $0x20] sm:$0xff]   ;;  %v724_v14 = vld [vmem:[#allocation3 + $0x68] sm:$0xff]   ;;  %v729_v15 = vld [vmem:[#allocation3 + $0x90] sm:$0xff]  }
  0x1a   :  { %v725_v16 = vld [vmem:[#allocation3 + $0x28] sm:$0xff]   ;;  %v49_v17 = vld [vmem:[%s941_s0] sm:$0xff]  ;;  %v734_v18 = vld [vmem:[#allocation3 + $0x98] ss:$0 sps:$4 sm:$0xff]  }
  0x1b   :  { %v727_v19 = vld [vmem:[#allocation3 + $0x70] sm:$0xff]   ;;  %v568_v20 = vcombine.high %v49_v17, %v49_v17  ;;  %v230_v22 = vsel %vm228_vm1, %v734_v18, 0  ;;  %v730_v23 = vld [vmem:[#allocation3 + $0x78] sm:$0xff]   ;;  %v735_v24 = vld [vmem:[%s941_s0 + $0x8] ss:$0 sps:$4 sm:$0xff]   ;;  %v567_v28 = vcombine.low %v49_v17, %v49_v17 }
  0x1c   :  { %614 = vmatpush3.bf16.msra.mxu0 %v716_v5  ;;  %659 = vmatpush3.bf16.msra.mxu1 %v726_v12  ;;  %v728_v21 = vld [vmem:[#allocation3 + $0x30] sm:$0xff]   ;;  %v736_v25 = vld [vmem:[%s944_s3] sm:$0xff]   ;;  %v737_v27 = vld [vmem:[%s944_s3 + $0x8] sm:$0xff]  }
  0x1d   :  { %615 = vmatprep.subr.bf16.mxu0 %v717_v6  ;;  %660 = vmatprep.subr.bf16.mxu1 %v779_v1  ;;  %v731_v26 = vld [vmem:[#allocation3 + $0x38] sm:$0xff]   ;;  %v738_v29 = vld [vmem:[%s944_s3 + $0x10] sm:$0xff]   ;;  %v741_v32 = vld [vmem:[%s944_s3 + $0x28] sm:$0xff]  }
  0x1e   :  { %264 = vmatprep.mubr.bf16.mxu0 %v568_v20  ;;  %v739_v30 = vld [vmem:[%s944_s3 + $0x18] sm:$0xff]   ;;  %v740_v31 = vld [vmem:[%s944_s3 + $0x20] sm:$0xff]   ;;  %v742_v33 = vld [vmem:[%s944_s3 + $0x30] sm:$0xff]  }
  0x1f   :  { %v743_v34 = vld [vmem:[%s944_s3 + $0x38] sm:$0xff]   ;;  %v744_v35 = vld [vmem:[%s946_s5] sm:$0xff]   ;;  %v745_v36 = vld [vmem:[%s946_s5 + $0x8] sm:$0xff]  }
  0x20   :  { %616 = vmatpush3.bf16.msra.mxu0 %v718_v7  ;;  %661 = vmatpush3.bf16.msra.mxu1 %v729_v15  ;;  %v746_v37 = vld [vmem:[%s946_s5 + $0x10] sm:$0xff]   ;;  %v747_v38 = vld [vmem:[%s946_s5 + $0x18] sm:$0xff]   ;;  %v748_v39 = vld [vmem:[%s946_s5 + $0x20] sm:$0xff]  }
  0x21   :  { %617 = vmatprep.subr.bf16.mxu0 %v719_v8  ;;  %662 = vmatprep.subr.bf16.mxu1 %v779_v1  ;;  %v749_v40 = vld [vmem:[%s946_s5 + $0x28] sm:$0xff]   ;;  %v566_v47 = vld [vmem:[%s943_s2] ss:$0 sm:$0xff]  ;;  %v750_v55 = vld [vmem:[%s946_s5 + $0x30] sm:$0xff]  }
  0x22   :  { %v751_v56 = vld [vmem:[%s946_s5 + $0x38] sm:$0xff]   ;;  %v591_v57 = vld [vmem:[%s945_s4] ss:$0 sm:$0xff] }
  0x23   :  { %v609_v6 = vld [vmem:[%s948_s7] ss:$0 sm:$0xff] }
  0x24   :  { %618 = vmatpush3.bf16.msra.mxu0 %v720_v10  ;;  %663 = vmatpush3.bf16.msra.mxu1 %v230_v22 }
  0x25   :  { %619 = vmatprep.subr.bf16.mxu0 %v721_v11  ;;  %668 = vmatprep.subr.bf16.mxu1 %v779_v1  ;;  %v610_v11 = vld [vmem:[#allocation2] ss:$0 sm:$0xff] }
  0x27   :  { %665 = vmatmul.mubr.msk.bf16.vlgmr.msra.gmra.mrb[0].mxu1 %vm224_vm2, %v735_v24 }
  0x28   :  { %620 = vmatpush3.bf16.msra.mxu0 %v722_v13  ;;  %669 = vmatpush3.bf16.msra.mxu1 %v736_v25 }
  0x29   :  { %621 = vmatprep.subr.bf16.mxu0 %v724_v14  ;;  %670 = vmatprep.subr.bf16.mxu1 %v779_v1 }
  0x2a   :  { %684 = vmatprep.mubr.msk.bf16.mxu1 %vm780_vm0, %v779_v1 }
  0x2c   :  { %622 = vmatpush3.bf16.msra.mxu0 %v725_v16  ;;  %671 = vmatpush3.bf16.msra.mxu1 %v737_v27 }
  0x2d   :  { %623 = vmatprep.subr.bf16.mxu0 %v727_v19  ;;  %672 = vmatprep.subr.bf16.mxu1 %v779_v1 }
  0x30   :  { %624 = vmatpush3.bf16.msra.mxu0 %v728_v21  ;;  %673 = vmatpush3.bf16.msra.mxu1 %v738_v29 }
  0x31   :  { %625 = vmatprep.subr.bf16.mxu0 %v730_v23  ;;  %674 = vmatprep.subr.bf16.mxu1 %v779_v1 }
  0x34   :  { %626 = vmatpush3.bf16.msra.mxu0 %v731_v26  ;;  %675 = vmatpush3.bf16.msra.mxu1 %v739_v30 }
  0x35   :  { %688 = vmatprep.subr.bf16.mxu0 %v779_v1  ;;  %676 = vmatprep.subr.bf16.mxu1 %v779_v1 }
  0x37   :  { %265 = vmatmul.mubr.bf16.vlgmr.msra.gmra.mrb[0].mxu0 %v567_v28 }
  0x38   :  { %704 = vmatprep.mubr.msk.bf16.mxu0 %vm780_vm0, %v779_v1  ;;  %677 = vmatpush3.bf16.msra.mxu1 %v740_v31 }
  0x39   :  { %678 = vmatprep.subr.bf16.mxu1 %v779_v1  ;;  %689 = vmatpush3.bf16.msra.mxu0 %v744_v35 }
  0x3a   :  { %690 = vmatprep.subr.bf16.mxu0 %v779_v1 }
  0x3c   :  { %679 = vmatpush3.bf16.msra.mxu1 %v741_v32 }
  0x3d   :  { %680 = vmatprep.subr.bf16.mxu1 %v779_v1  ;;  %691 = vmatpush3.bf16.msra.mxu0 %v745_v36 }
  0x3e   :  { %692 = vmatprep.subr.bf16.mxu0 %v779_v1 }
  0x40   :  { %681 = vmatpush3.bf16.msra.mxu1 %v742_v33 }
  0x41   :  { %682 = vmatprep.subr.bf16.mxu1 %v779_v1  ;;  %693 = vmatpush3.bf16.msra.mxu0 %v746_v37 }
  0x42   :  { %694 = vmatprep.subr.bf16.mxu0 %v779_v1 }
  0x44   :  { %683 = vmatpush3.bf16.msra.mxu1 %v743_v34 }
  0x45   :  { %695 = vmatpush3.bf16.msra.mxu0 %v747_v38 }
  0x46   :  { %696 = vmatprep.subr.bf16.mxu0 %v779_v1 }
  0x49   :  { %697 = vmatpush3.bf16.msra.mxu0 %v748_v39 }
  0x4a   :  { %698 = vmatprep.subr.bf16.mxu0 %v779_v1 }
  0x4d   :  { %699 = vmatpush3.bf16.msra.mxu0 %v749_v40 }
  0x4e   :  { %700 = vmatprep.subr.bf16.mxu0 %v779_v1 }
  0x51   :  { %701 = vmatpush3.bf16.msra.mxu0 %v750_v55 }
  0x52   :  { %702 = vmatprep.subr.bf16.mxu0 %v779_v1  ;;  %v600_v1 = vld [vmem:[%s947_s6] ss:$0 sm:$0xff] }
  0x55   :  { %703 = vmatpush3.bf16.msra.mxu0 %v751_v56 }
  0xfa   :  { %v306_v41 = vpop.f32.mrb[0].mxu1 }
  0xfb   :  { %v666_v42 = vpop.f32.mrb[1].mxu1 }
  0xfc   :  { %v309_v43 = vpop.f32.mrb[2].mxu1 }
  0xfd   :  { %v667_v44 = vpop.f32.mrb[3].mxu1 }
 0x10a   :  { %v627_v45 = vpop.f32.mrb[0].mxu0 }
 0x10b   :  { %v628_v46 = vpop.f32.mrb[1].mxu0 }
 0x10c   :  { %v629_v48 = vadd.f32 %v628_v46, %v627_v45  ;;  %v630_v49 = vpop.f32.mrb[2].mxu0 }
 0x10d   :  { %v631_v50 = vpop.f32.mrb[3].mxu0 }
 0x10e   :  { %v267_v51 = vadd.f32 %v629_v48, %v566_v47 }
 0x110   :  { %v307_v52 = vadd.f32 %v306_v41, %v267_v51 }
 0x112   :  { %v312_v53 = vmax.f32 %v307_v52, 0.0 }
 0x114   :  { %v313_v54 = vpack.c.bf16 %v312_v53, %v312_v53 }
 0x116   :  { %685 = vmatmul.mubr.bf16.vlgmr.msra.gmra.mrb[4].mxu1 %v313_v54 }
 0x1e9   :  { %v419_v58 = vpop.f32.mrb[4].mxu1 }
 0x1ea   :  { %v420_v59 = vadd.f32 %v591_v57, %v419_v58  ;;  %v686_v60 = vpop.f32.mrb[5].mxu1 }
 0x1eb   :  { %v422_v61 = vpop.f32.mrb[6].mxu1 }
 0x1ec   :  { %v425_v62 = vmax.f32 %v420_v59, 0.0  ;;  %v687_v63 = vpop.f32.mrb[7].mxu1 }
 0x1ee   :  { %v426_v0 = vpack.c.bf16 %v425_v62, %v425_v62 }
 0x1f0   :  { %705 = vmatmul.mubr.bf16.vlgmr.msra.gmra.mrb[4].mxu0 %v426_v0 }
 0x2c3   :  { %v532_v2 = vpop.f32.mrb[4].mxu0 }
 0x2c4   :  { %v533_v3 = vadd.f32 %v600_v1, %v532_v2  ;;  %v706_v4 = vpop.f32.mrb[5].mxu0 }
 0x2c5   :  { %v535_v5 = vpop.f32.mrb[6].mxu0 }
 0x2c6   :  { %v538_v7 = vmax.f32 %v533_v3, 0.0  ;;  %v707_v8 = vpop.f32.mrb[7].mxu0 }
 0x2c8   :  { %v546_v9 = vmul.f32 %v609_v6, %v538_v7 }
 0x2ca   :  { %v548_v10 = vsel %vm547_vm3, %v546_v9, 0.0 }
 0x2cb   :  { %549 = vadd.xlane.f32.xlu0 %v548_v10 }
 0x358   :  { %v550_v12 = vpop.xlane.xlu0 %549 }
 0x359   :  { %v558_v13 = vadd.f32 %v610_v11, %v550_v12 }
 0x35b   :  { %560 = vst.msk [vmem:[%s950_s9] sm:$0xff] %vm559_vm4, %v558_v13 }
 0x35c   :  { %565 = vsyncpa [#allocation4], 1 }

</bundles_post_ra>
